<compile_context>
chip_gen: v6e
topology: v6e:2x2x1
jax: 0.10.0
libtpu: 0.0.40
codegen_flags: <defaults>
</compile_context>

<pallas_src>
import functools

import jax
import jax.numpy as jnp
from jax.experimental import pallas as pl
from jax.experimental.pallas import tpu as pltpu


# ----------------------------- Pallas kernel ------------------------------- #
def _upsample_conv_kernel(xh_ref, wb_ref, pht_ref, bias_ref, o_ref, *, kh):
    """One batch element per grid step; matmul + col2im + bias fully fused.

    xh_ref:   (1, H, Cin*W)            input, rows = h, cols = (ci, w)
    wb_ref:   (Kh, Cin*W, Cout*W_out)  weight with W-axis col2im placement folded in
    pht_ref:  (Kh, H_out, H)           0/1 H-axis placement matrix per kernel row d
    bias_ref: (1, Cout*W_out)          bias repeated over W_out (cols ordered (c, q))
    o_ref:    (1, H_out, Cout*W_out)   fused output tile
    """
    xh = xh_ref[0]                                           # (H, Cin*W)
    acc = jnp.zeros(o_ref.shape[1:], dtype=jnp.float32)      # (H_out, Cout*W_out)

    # Static unrolled loop over the Kh kernel rows (kh is tiny, e.g. 3).
    for d in range(kh):
        # Contract (ci, w) on the MXU: W-axis placement already folded into wb.
        t_d = jnp.dot(xh, wb_ref[d], preferred_element_type=jnp.float32)
        # H-axis col2im placement: another small MXU matmul with a 0/1 matrix.
        acc = acc + jnp.dot(pht_ref[d], t_d, preferred_element_type=jnp.float32)

    o_ref[0] = (acc + bias_ref[...]).astype(o_ref.dtype)


def _upsample_conv_pallas(xh, wb, pht, bias_row, *, h_out, kh):
    n, h, cinw = xh.shape
    _, _, cwout = wb.shape

    kernel = functools.partial(_upsample_conv_kernel, kh=kh)
    return pl.pallas_call(
        kernel,
        out_shape=jax.ShapeDtypeStruct((n, h_out, cwout), jnp.float32),
        grid=(n,),
        in_specs=[
            pl.BlockSpec((1, h, cinw), lambda i: (i, 0, 0)),       # per-image tile
            pl.BlockSpec((kh, cinw, cwout), lambda i: (0, 0, 0)),  # resident weights
            pl.BlockSpec((kh, h_out, h), lambda i: (0, 0, 0)),     # resident placement
            pl.BlockSpec((1, cwout), lambda i: (0, 0)),            # resident bias
        ],
        out_specs=pl.BlockSpec((1, h_out, cwout), lambda i: (i, 0, 0)),
        compiler_params=pltpu.CompilerParams(
            dimension_semantics=("parallel",)),
    )(xh, wb, pht, bias_row)


# --------------------------- UpsampleConv module ---------------------------- #
class UpsampleConv:
    """JAX/Pallas port of the PyTorch UpsampleConv (ConvTranspose2d, padding=0)."""

    def __init__(self, in_channels, out_channels, kernel_size, stride, key):
        if isinstance(kernel_size, int):
            kernel_size = (kernel_size, kernel_size)
        if isinstance(stride, int):
            stride = (stride, stride)
        self.in_channels = in_channels
        self.out_channels = out_channels
        self.kernel_size = kernel_size
        self.stride = stride

        kh, kw = kernel_size
        k_w, k_b = jax.random.split(key)
        # PyTorch ConvTranspose2d weight layout: (Cin, Cout, kH, kW).
        # fan_in for ConvTranspose2d is out_channels * kh * kw.
        bound = 1.0 / jnp.sqrt(jnp.float32(out_channels * kh * kw))
        self.weight = jax.random.uniform(
            k_w, (in_channels, out_channels, kh, kw),
            dtype=jnp.float32, minval=-bound, maxval=bound)
        self.bias = jax.random.uniform(
            k_b, (out_channels,), dtype=jnp.float32, minval=-bound, maxval=bound)

    def __call__(self, x):
        return upsample_conv_forward(x, self.weight, self.bias, self.stride)


@functools.partial(jax.jit, static_argnums=(3,))
def upsample_conv_forward(x, weight, bias, stride):
    """x: (N, Cin, H, W) NCHW -> (N, Cout, Hout, Wout) NCHW.

    ConvTranspose2d semantics (padding=0):
      Hout = (H - 1) * s_h + Kh,  Wout = (W - 1) * s_w + Kw
      out[n, co, h*s_h + dkh, w*s_w + dkw] += sum_ci x[n,ci,h,w] * W[ci,co,dkh,dkw]
    """
    n, cin, h, w = x.shape
    cin_w, cout, kh, kw = weight.shape
    assert cin == cin_w
    s_h, s_w = stride
    h_out = (h - 1) * s_h + kh
    w_out = (w - 1) * s_w + kw

    # ---- tiny host/XLA-side prep (one cheap pass over x, weight-only einsum) ----
    # Input presented lane-dense: rows = h, cols = (ci, w).
    xh = jnp.transpose(x, (0, 2, 1, 3)).reshape(n, h, cin * w)

    # W-axis placement: Pw[e, w, q] = 1 iff q == w*s_w + e.
    q_idx = jnp.arange(w_out)
    w_idx = jnp.arange(w)
    e_idx = jnp.arange(kw)
    pw = (q_idx[None, None, :] ==
          (w_idx[None, :, None] * s_w + e_idx[:, None, None])).astype(jnp.float32)

    # Fold the W placement into the weights:
    #   WB[d, (ci,w), (c,q)] = sum_e weight[ci,c,d,e] * Pw[e,w,q]
    wb = jnp.einsum('icde,ewq->diwcq', weight, pw).reshape(kh, cin * w, cout * w_out)

    # H-axis placement (pre-transposed): Pht[d, p, h] = 1 iff p == h*s_h + d.
    p_idx = jnp.arange(h_out)
    h_idx = jnp.arange(h)
    d_idx = jnp.arange(kh)
    pht = (p_idx[None, :, None] ==
           (h_idx[None, None, :] * s_h + d_idx[:, None, None])).astype(jnp.float32)

    # Bias laid out to match the kernel's (c, q) column ordering.
    bias_row = jnp.repeat(bias, w_out).reshape(1, cout * w_out)

    # Fused Pallas kernel: matmul + col2im + bias, one output write per image.
    out_flat = _upsample_conv_pallas(xh, wb, pht, bias_row, h_out=h_out, kh=kh)

    # (N, H_out, Cout*W_out) -> (N, Cout, H_out, W_out): single post-kernel transpose.
    return jnp.transpose(out_flat.reshape(n, h_out, cout, w_out), (0, 2, 1, 3))


# -------------------------------- reference --------------------------------- #
def _reference_conv_transpose(x, weight, bias, stride):
    """Pure-XLA reference: conv_transpose == dilated conv with flipped kernel."""
    cin, cout, kh, kw = weight.shape
    s_h, s_w = stride
    # (Cin, Cout, Kh, Kw) -> (Cout, Cin, Kh, Kw), spatially flipped.
    w_oihw = jnp.flip(jnp.transpose(weight, (1, 0, 2, 3)), axis=(2, 3))
    out = jax.lax.conv_general_dilated(
        x, w_oihw,
        window_strides=(1, 1),
        padding=[(kh - 1, kh - 1), (kw - 1, kw - 1)],
        lhs_dilation=(s_h, s_w),
        rhs_dilation=(1, 1),
        dimension_numbers=('NCHW', 'OIHW', 'NCHW'))
    return out + bias[None, :, None, None]


# ---------------------------------- main ------------------------------------ #
if __name__ == "__main__":
    key = jax.random.PRNGKey(0)
    k_x, k_params = jax.random.split(key)

    # Small shapes: batch=2, in_channels=4, out_channels=8, spatial=16,
    # kernel_size=3, stride=2 -> output (2, 8, 33, 33).
    x = jax.random.normal(k_x, (2, 4, 16, 16), dtype=jnp.float32)

    block = UpsampleConv(in_channels=4, out_channels=8,
                         kernel_size=3, stride=2, key=k_params)

    out = jax.block_until_ready(block(x))

    ref = _reference_conv_transpose(x, block.weight, block.bias, block.stride)
    assert out.shape == ref.shape == (2, 8, 33, 33), (out.shape, ref.shape)
    assert jnp.allclose(out, ref, atol=1e-3, rtol=1e-3), \
        float(jnp.max(jnp.abs(out - ref)))

    print("KERNEL_OK")
</pallas_src>

<mosaic_0001>
module attributes {stable_mosaic.version = 11 : i64} {
  func.func @_upsample_conv_kernel(%arg0: i32, %arg1: memref<1x16x64xf32, #tpu.memory_space<vmem>>, %arg2: memref<3x64x264xf32, #tpu.memory_space<vmem>>, %arg3: memref<3x33x16xf32, #tpu.memory_space<vmem>>, %arg4: memref<1x264xf32, #tpu.memory_space<vmem>>, %arg5: memref<1x33x264xf32, #tpu.memory_space<vmem>>) attributes {dimension_semantics = [#tpu.dimension_semantics<parallel>], iteration_bounds = array<i64: 2>, scalar_prefetch = 0 : i64, scratch_operands = 0 : i64, tpu.core_type = #tpu.core_type<tc>, window_params = [{transform_indices = @transform_0, window_bounds = array<i64: 1, 16, 64>}, {pipeline_mode = #tpu.pipeline_mode<synchronous>, transform_indices = @transform_1, window_bounds = array<i64: 3, 64, 264>}, {pipeline_mode = #tpu.pipeline_mode<synchronous>, transform_indices = @transform_2, window_bounds = array<i64: 3, 33, 16>}, {pipeline_mode = #tpu.pipeline_mode<synchronous>, transform_indices = @transform_3, window_bounds = array<i64: 1, 264>}, {transform_indices = @transform_4, window_bounds = array<i64: 1, 33, 264>}]} {
    %c0 = arith.constant 0 : index
    %c0_0 = arith.constant 0 : index
    %c0_1 = arith.constant 0 : index
    %0 = vector.load %arg1[%c0, %c0_0, %c0_1] : memref<1x16x64xf32, #tpu.memory_space<vmem>>, vector<1x16x64xf32>
    %1 = vector.shape_cast %0 : vector<1x16x64xf32> to vector<16x64xf32>
    %cst = arith.constant 0.000000e+00 : f32
    %2 = vector.broadcast %cst : f32 to vector<33x264xf32>
    %c0_2 = arith.constant 0 : index
    %c0_3 = arith.constant 0 : index
    %c0_4 = arith.constant 0 : index
    %3 = vector.load %arg2[%c0_2, %c0_3, %c0_4] : memref<3x64x264xf32, #tpu.memory_space<vmem>>, vector<1x64x264xf32>
    %4 = vector.shape_cast %3 : vector<1x64x264xf32> to vector<64x264xf32>
    %cst_5 = arith.constant dense<0.000000e+00> : vector<16x264xf32>
    %5 = tpu.matmul %1, %4, %cst_5 {dimension_numbers = #tpu.dot_dimension_numbers<[1], [0], [0], [1], [0, 0, 1, 1], [], []>} : vector<16x64xf32>, vector<64x264xf32>, vector<16x264xf32> -> vector<16x264xf32>
    %c0_6 = arith.constant 0 : index
    %c0_7 = arith.constant 0 : index
    %c0_8 = arith.constant 0 : index
    %6 = vector.load %arg3[%c0_6, %c0_7, %c0_8] : memref<3x33x16xf32, #tpu.memory_space<vmem>>, vector<1x33x16xf32>
    %7 = vector.shape_cast %6 : vector<1x33x16xf32> to vector<33x16xf32>
    %cst_9 = arith.constant dense<0.000000e+00> : vector<33x264xf32>
    %8 = tpu.matmul %7, %5, %cst_9 {dimension_numbers = #tpu.dot_dimension_numbers<[1], [0], [0], [1], [0, 0, 1, 1], [], []>} : vector<33x16xf32>, vector<16x264xf32>, vector<33x264xf32> -> vector<33x264xf32>
    %9 = arith.addf %2, %8 : vector<33x264xf32>
    %c1 = arith.constant 1 : index
    %c0_10 = arith.constant 0 : index
    %c0_11 = arith.constant 0 : index
    %10 = vector.load %arg2[%c1, %c0_10, %c0_11] : memref<3x64x264xf32, #tpu.memory_space<vmem>>, vector<1x64x264xf32>
    %11 = vector.shape_cast %10 : vector<1x64x264xf32> to vector<64x264xf32>
    %cst_12 = arith.constant dense<0.000000e+00> : vector<16x264xf32>
    %12 = tpu.matmul %1, %11, %cst_12 {dimension_numbers = #tpu.dot_dimension_numbers<[1], [0], [0], [1], [0, 0, 1, 1], [], []>} : vector<16x64xf32>, vector<64x264xf32>, vector<16x264xf32> -> vector<16x264xf32>
    %c1_13 = arith.constant 1 : index
    %c0_14 = arith.constant 0 : index
    %c0_15 = arith.constant 0 : index
    %13 = vector.load %arg3[%c1_13, %c0_14, %c0_15] : memref<3x33x16xf32, #tpu.memory_space<vmem>>, vector<1x33x16xf32>
    %14 = vector.shape_cast %13 : vector<1x33x16xf32> to vector<33x16xf32>
    %cst_16 = arith.constant dense<0.000000e+00> : vector<33x264xf32>
    %15 = tpu.matmul %14, %12, %cst_16 {dimension_numbers = #tpu.dot_dimension_numbers<[1], [0], [0], [1], [0, 0, 1, 1], [], []>} : vector<33x16xf32>, vector<16x264xf32>, vector<33x264xf32> -> vector<33x264xf32>
    %16 = arith.addf %9, %15 : vector<33x264xf32>
    %c2 = arith.constant 2 : index
    %c0_17 = arith.constant 0 : index
    %c0_18 = arith.constant 0 : index
    %17 = vector.load %arg2[%c2, %c0_17, %c0_18] : memref<3x64x264xf32, #tpu.memory_space<vmem>>, vector<1x64x264xf32>
    %18 = vector.shape_cast %17 : vector<1x64x264xf32> to vector<64x264xf32>
    %cst_19 = arith.constant dense<0.000000e+00> : vector<16x264xf32>
    %19 = tpu.matmul %1, %18, %cst_19 {dimension_numbers = #tpu.dot_dimension_numbers<[1], [0], [0], [1], [0, 0, 1, 1], [], []>} : vector<16x64xf32>, vector<64x264xf32>, vector<16x264xf32> -> vector<16x264xf32>
    %c2_20 = arith.constant 2 : index
    %c0_21 = arith.constant 0 : index
    %c0_22 = arith.constant 0 : index
    %20 = vector.load %arg3[%c2_20, %c0_21, %c0_22] : memref<3x33x16xf32, #tpu.memory_space<vmem>>, vector<1x33x16xf32>
    %21 = vector.shape_cast %20 : vector<1x33x16xf32> to vector<33x16xf32>
    %cst_23 = arith.constant dense<0.000000e+00> : vector<33x264xf32>
    %22 = tpu.matmul %21, %19, %cst_23 {dimension_numbers = #tpu.dot_dimension_numbers<[1], [0], [0], [1], [0, 0, 1, 1], [], []>} : vector<33x16xf32>, vector<16x264xf32>, vector<33x264xf32> -> vector<33x264xf32>
    %23 = arith.addf %16, %22 : vector<33x264xf32>
    %c0_24 = arith.constant 0 : index
    %c0_25 = arith.constant 0 : index
    %24 = vector.load %arg4[%c0_24, %c0_25] : memref<1x264xf32, #tpu.memory_space<vmem>>, vector<1x264xf32>
    %25 = vector.broadcast %24 : vector<1x264xf32> to vector<33x264xf32>
    %26 = arith.addf %23, %25 : vector<33x264xf32>
    %c0_26 = arith.constant 0 : index
    %c0_27 = arith.constant 0 : index
    %c0_28 = arith.constant 0 : index
    %27 = vector.load %arg5[%c0_26, %c0_27, %c0_28] : memref<1x33x264xf32, #tpu.memory_space<vmem>>, vector<1x33x264xf32>
    %28 = vector.shape_cast %27 : vector<1x33x264xf32> to vector<33x264xf32>
    %29 = vector.shape_cast %26 : vector<33x264xf32> to vector<1x33x264xf32>
    tpu.vector_store %arg5[%c0_26, %c0_27, %c0_28], %29 {strides = array<i32>} : memref<1x33x264xf32, #tpu.memory_space<vmem>>, vector<1x33x264xf32>,
    return
  }
  func.func @transform_0(%arg0: i32) -> (i32, i32, i32) {
    %c0_i32 = arith.constant 0 : i32
    %c0_i32_0 = arith.constant 0 : i32
    %c0_i32_1 = arith.constant 0 : i32
    return %arg0, %c0_i32, %c0_i32_0 : i32, i32, i32
  }
  func.func @transform_1(%arg0: i32) -> (i32, i32, i32) {
    %c0_i32 = arith.constant 0 : i32
    %c0_i32_0 = arith.constant 0 : i32
    %c0_i32_1 = arith.constant 0 : i32
    %c0_i32_2 = arith.constant 0 : i32
    return %c0_i32, %c0_i32_0, %c0_i32_1 : i32, i32, i32
  }
  func.func @transform_2(%arg0: i32) -> (i32, i32, i32) {
    %c0_i32 = arith.constant 0 : i32
    %c0_i32_0 = arith.constant 0 : i32
    %c0_i32_1 = arith.constant 0 : i32
    %c0_i32_2 = arith.constant 0 : i32
    return %c0_i32, %c0_i32_0, %c0_i32_1 : i32, i32, i32
  }
  func.func @transform_3(%arg0: i32) -> (i32, i32) {
    %c0_i32 = arith.constant 0 : i32
    %c0_i32_0 = arith.constant 0 : i32
    %c0_i32_1 = arith.constant 0 : i32
    return %c0_i32, %c0_i32_0 : i32, i32
  }
  func.func @transform_4(%arg0: i32) -> (i32, i32, i32) {
    %c0_i32 = arith.constant 0 : i32
    %c0_i32_0 = arith.constant 0 : i32
    %c0_i32_1 = arith.constant 0 : i32
    return %arg0, %c0_i32, %c0_i32_0 : i32, i32, i32
  }
}

</mosaic_0001>

<bundles_post_ra>
// kernel: upsample_conv_forward.1
= control target key start
LH: loop header
LB: loop body
LE: loop exit
PB: predicated region body
PF: predicated region fallthrough
CT: control target
= control target key end

     0   :  { %s1796_s15 = smov 0   ;;  %s2268_s0 = inlined_call_operand.vmem [shape: f32[2,16,64], index: 0, kind: input, shape index: {}]   ;;  %s2269_s1 = inlined_call_operand.vmem [shape: f32[3,64,264], index: 1, kind: input, shape index: {}]   ;;  %s2270_s2 = inlined_call_operand.vmem [shape: f32[3,33,16], index: 2, kind: input, shape index: {}]   ;;  %s2271_s3 = inlined_call_operand.vmem [shape: f32[1,264], index: 3, kind: input, shape index: {}]   ;;  %s2272_s4 = inlined_call_operand.vmem [shape: f32[2,33,264], index: 4, kind: output, shape index: {}]  }
   0x1 LB: > { %s1474_s16 = sadd.s32 4294967295, %s1767_s15   ;;  %p1478_p0 = scmp.ge.s32.totalorder %s1767_s15, 1  ;;  %s1767_s15 = sphi %s1796_s15, %s14_s15  }
   0x2   : > { %p162_p1 = scmp.lt.s32.totalorder %s1767_s15, 3 }
   0x4   : > { %p163_p2 = pnand %p1478_p0, %p162_p1 }
   0x5   : > { %p1813_p3 = scmp.lt.s32.totalorder (!%p163_p2), %s1474_s16, 1 }
   0x6   : > { %166 = sbr.rel (%p163_p2) target bundleno = 712 (0x2c8), region = 36 }
   0xb   : > { %v222_v0 = vld [vmem:[%s2269_s1 + $0xb0] sm:$0xff]  ;;  %v223_v1 = vld [vmem:[%s2269_s1 + $0xb8] sm:$0xff]  ;;  %v221_v2 = vld [vmem:[%s2269_s1 + $0xa8] sm:$0xff]  ;;  %s2275_s16 = smov (!%p1813_p3, %s1474_s16), 1  ;;  %vm224_vm0 = vcmask 523264   ;;  %v1769_v26 = vmov 0.0  }
   0xc   : > { %247 = vmatprep.subr.mxu0 %v222_v0  ;;  %1636 = vmatprep.subr.mxu1 %v223_v1  ;;  %v219_v3 = vld [vmem:[%s2269_s1 + $0x98] sm:$0xff]  ;;  %v220_v4 = vld [vmem:[%s2269_s1 + $0xa0] sm:$0xff]  ;;  %v218_v5 = vld [vmem:[%s2269_s1 + $0x90] sm:$0xff]  ;;  %s1584_s28 = sshll.u32 %s2275_s16, 4  ;;  %vm1770_vm1 = vmmov 0   ;;  %vm571_vm2 = vcmask 130048  }
   0xd   : > { %248 = vmatpush1.msra.mxu0 %v221_v2  ;;  %1637 = vmatpush3.msra.mxu1 %v223_v1  ;;  %v216_v6 = vld [vmem:[%s2269_s1 + $0x80] sm:$0xff]  ;;  %v217_v7 = vld [vmem:[%s2269_s1 + $0x88] sm:$0xff]  ;;  %v215_v8 = vld [vmem:[%s2269_s1 + $0x78] sm:$0xff]  ;;  %s192_s13 = scalar_lea.vmem %s2268_s0, %s1584_s28  ;;  %s1750_s30 = smul.u32 120, %s2275_s16  ;;  %vm1404_vm3 = vcmask 64512   ;;  %vm1417_vm4 = vcmask 57344  }
   0xe   : > { %249 = vmatprep.subr.mxu0 %v219_v3  ;;  %1638 = vmatprep.subr.mxu1 %v220_v4  ;;  %v213_v9 = vld [vmem:[%s2269_s1 + $0x68] sm:$0xff]  ;;  %v214_v10 = vld [vmem:[%s2269_s1 + $0x70] sm:$0xff]  ;;  %v212_v11 = vld [vmem:[%s2269_s1 + $0x60] sm:$0xff] }
   0xf   : > { %250 = vmatpush1.msra.mxu0 %v218_v5  ;;  %1639 = vmatpush3.msra.mxu1 %v220_v4  ;;  %v210_v12 = vld [vmem:[%s2269_s1 + $0x50] sm:$0xff]  ;;  %v211_v13 = vld [vmem:[%s2269_s1 + $0x58] sm:$0xff]  ;;  %v209_v14 = vld [vmem:[%s2269_s1 + $0x48] sm:$0xff]  ;;  %s2230_s7 = scalar_lea.vmem %s2272_s4, %s1750_s30 }
  0x10   : > { %251 = vmatprep.subr.mxu0 %v216_v6  ;;  %1640 = vmatprep.subr.mxu1 %v217_v7  ;;  %v207_v15 = vld [vmem:[%s2269_s1 + $0x38] sm:$0xff]  ;;  %v208_v16 = vld [vmem:[%s2269_s1 + $0x40] sm:$0xff]  ;;  %v206_v17 = vld [vmem:[%s2269_s1 + $0x30] sm:$0xff] }
  0x11   : > { %252 = vmatpush1.msra.mxu0 %v215_v8  ;;  %1641 = vmatpush3.msra.mxu1 %v217_v7  ;;  %v204_v18 = vld [vmem:[%s2269_s1 + $0x20] sm:$0xff]  ;;  %v205_v19 = vld [vmem:[%s2269_s1 + $0x28] sm:$0xff]  ;;  %v203_v20 = vld [vmem:[%s2269_s1 + $0x18] sm:$0xff] }
  0x12   : > { %253 = vmatprep.subr.mxu0 %v213_v9  ;;  %1642 = vmatprep.subr.mxu1 %v214_v10  ;;  %v201_v21 = vld [vmem:[%s2269_s1 + $0x8] sm:$0xff]  ;;  %v202_v22 = vld [vmem:[%s2269_s1 + $0x10] sm:$0xff]  ;;  %v200_v23 = vld [vmem:[%s2269_s1] sm:$0xff] }
  0x13   : > { %254 = vmatpush1.msra.mxu0 %v212_v11  ;;  %1643 = vmatpush3.msra.mxu1 %v214_v10  ;;  %v1888_v24 = vld [vmem:[%s192_s13] sm:$0xff]  ;;  %v1508_v25 = vld [vmem:[%s2269_s1 + $0x170] sm:$0xff]  ;;  %v1509_v27 = vld [vmem:[%s2269_s1 + $0x178] sm:$0xff] }
  0x14   : > { %255 = vmatprep.subr.mxu0 %v210_v12  ;;  %1644 = vmatprep.subr.mxu1 %v211_v13  ;;  %v1897_v28 = vld [vmem:[%s192_s13 + $0x8] sm:$0xff]  ;;  %v1505_v30 = vld [vmem:[%s2269_s1 + $0x158] sm:$0xff]  ;;  %v1506_v31 = vld [vmem:[%s2269_s1 + $0x160] sm:$0xff] }
  0x15   : > { %256 = vmatpush1.msra.mxu0 %v209_v14  ;;  %1645 = vmatpush3.msra.mxu1 %v211_v13  ;;  %v1507_v29 = vld [vmem:[%s2269_s1 + $0x168] sm:$0xff]  ;;  %v1504_v32 = vld [vmem:[%s2269_s1 + $0x150] sm:$0xff]  ;;  %v1502_v33 = vld [vmem:[%s2269_s1 + $0x140] sm:$0xff] }
  0x16   : > { %257 = vmatprep.subr.mxu0 %v207_v15  ;;  %1646 = vmatprep.subr.mxu1 %v208_v16  ;;  %v1503_v34 = vld [vmem:[%s2269_s1 + $0x148] sm:$0xff]  ;;  %v1501_v35 = vld [vmem:[%s2269_s1 + $0x138] sm:$0xff]  ;;  %v1500_v37 = vld [vmem:[%s2269_s1 + $0x130] sm:$0xff] }
  0x17   : > { %258 = vmatpush1.msra.mxu0 %v206_v17  ;;  %1647 = vmatpush3.msra.mxu1 %v208_v16  ;;  %v1499_v36 = vld [vmem:[%s2269_s1 + $0x128] sm:$0xff]  ;;  %v1498_v38 = vld [vmem:[%s2269_s1 + $0x120] sm:$0xff]  ;;  %v1496_v39 = vld [vmem:[%s2269_s1 + $0x110] sm:$0xff] }
  0x18   : > { %259 = vmatprep.subr.mxu0 %v204_v18  ;;  %1648 = vmatprep.subr.mxu1 %v205_v19  ;;  %v1497_v40 = vld [vmem:[%s2269_s1 + $0x118] sm:$0xff]  ;;  %v1495_v41 = vld [vmem:[%s2269_s1 + $0x108] sm:$0xff]  ;;  %v1494_v43 = vld [vmem:[%s2269_s1 + $0x100] sm:$0xff] }
  0x19   : > { %260 = vmatpush1.msra.mxu0 %v203_v20  ;;  %1649 = vmatpush3.msra.mxu1 %v205_v19  ;;  %v1493_v42 = vld [vmem:[%s2269_s1 + $0xf8] sm:$0xff]  ;;  %v1492_v44 = vld [vmem:[%s2269_s1 + $0xf0] sm:$0xff]  ;;  %v1490_v45 = vld [vmem:[%s2269_s1 + $0xe0] sm:$0xff] }
  0x1a   : > { %261 = vmatprep.subr.mxu0 %v201_v21  ;;  %1650 = vmatprep.subr.mxu1 %v202_v22  ;;  %v1491_v46 = vld [vmem:[%s2269_s1 + $0xe8] sm:$0xff]  ;;  %v1489_v47 = vld [vmem:[%s2269_s1 + $0xd8] sm:$0xff]  ;;  %v1488_v49 = vld [vmem:[%s2269_s1 + $0xd0] sm:$0xff] }
  0x1b   : > { %262 = vmatpush1.msra.mxu0 %v200_v23  ;;  %295 = vmatprep.mubr.f32.mxu0 %v1769_v26  ;;  %v1487_v48 = vld [vmem:[%s2269_s1 + $0xc8] sm:$0xff]  ;;  %v1486_v50 = vld [vmem:[%s2269_s1 + $0xc0] sm:$0xff]  ;;  %v1515_v63 = vld [vmem:[%s2270_s2 + $0x30] sm:$0xff] }
  0x1c   : > { %1651 = vmatpush3.msra.mxu1 %v202_v22  ;;  %1482 = vmatmul.mubr.msk.f32.vlgmr.msra.gmra.mxu0 %vm224_vm0, %v1888_v24  ;;  %v1514_v59 = vld [vmem:[%s2270_s2 + $0x28] sm:$0xff]  ;;  %v1562_v1 = vld [vmem:[%s2269_s1 + $0x238] sm:$0xff]  ;;  %v1561_v3 = vld [vmem:[%s2269_s1 + $0x230] sm:$0xff] }
  0x1d   : > { %1652 = vmatprep.mubr.msk.f32.mxu1 %vm224_vm0, %v1888_v24  ;;  %429 = vmatprep.subr.mxu0 %v1508_v25  ;;  %v1516_v2 = vld [vmem:[%s2270_s2 + $0x38] sm:$0xff]  ;;  %v1517_v4 = vld [vmem:[%s2270_s2 + $0x40] sm:$0xff]  ;;  %v1518_v5 = vld [vmem:[%s2270_s2 + $0x48] sm:$0x1] }
  0x1e   : > { %1655 = vmatprep.subr.mxu1 %v1509_v27  ;;  %1653 = vmatmul.mubr.msk.f32.vlgmr.msra.gmra.mxu1 %vm224_vm0, %v1897_v28  ;;  %v383_v6 = vld [vmem:[%s2270_s2] sm:$0xff]  ;;  %v384_v8 = vld [vmem:[%s2270_s2 + $0x8] sm:$0xff]  ;;  %v1553_v10 = vld [vmem:[%s2269_s1 + $0x1f0] sm:$0xff] }
  0x1f   : > { %430 = vmatpush1.msra.mxu0 %v1507_v29  ;;  %1656 = vmatpush3.msra.mxu1 %v1509_v27  ;;  %v1559_v7 = vld [vmem:[%s2269_s1 + $0x220] sm:$0xff]  ;;  %v1556_v9 = vld [vmem:[%s2269_s1 + $0x208] sm:$0xff]  ;;  %v385_v11 = vld [vmem:[%s2270_s2 + $0x10] sm:$0xff] }
  0x20   : > { %431 = vmatprep.subr.mxu0 %v1505_v30  ;;  %1657 = vmatprep.subr.mxu1 %v1506_v31  ;;  %v1560_v12 = vld [vmem:[%s2269_s1 + $0x228] sm:$0xff]  ;;  %v1558_v13 = vld [vmem:[%s2269_s1 + $0x218] sm:$0xff]  ;;  %v1557_v14 = vld [vmem:[%s2269_s1 + $0x210] sm:$0xff] }
  0x21   : > { %432 = vmatpush1.msra.mxu0 %v1504_v32  ;;  %1658 = vmatpush3.msra.mxu1 %v1506_v31  ;;  %v386_v15 = vld [vmem:[%s2270_s2 + $0x18] sm:$0xff]  ;;  %v1555_v16 = vld [vmem:[%s2269_s1 + $0x200] sm:$0xff]  ;;  %v1552_v20 = vld [vmem:[%s2269_s1 + $0x1e8] sm:$0xff] }
  0x22   : > { %433 = vmatprep.subr.mxu0 %v1502_v33  ;;  %1659 = vmatprep.subr.mxu1 %v1503_v34  ;;  %v1550_v17 = vld [vmem:[%s2269_s1 + $0x1d8] sm:$0xff]  ;;  %v1547_v19 = vld [vmem:[%s2269_s1 + $0x1c0] sm:$0xff]  ;;  %v1544_v23 = vld [vmem:[%s2269_s1 + $0x1a8] sm:$0xff] }
  0x23   : > { %434 = vmatpush1.msra.mxu0 %v1501_v35  ;;  %1660 = vmatpush3.msra.mxu1 %v1503_v34  ;;  %v1554_v18 = vld [vmem:[%s2269_s1 + $0x1f8] sm:$0xff]  ;;  %v1551_v21 = vld [vmem:[%s2269_s1 + $0x1e0] sm:$0xff]  ;;  %v1549_v25 = vld [vmem:[%s2269_s1 + $0x1d0] sm:$0xff] }
  0x24   : > { %435 = vmatprep.subr.mxu0 %v1499_v36  ;;  %1661 = vmatprep.subr.mxu1 %v1500_v37  ;;  %v387_v22 = vld [vmem:[%s2270_s2 + $0x20] sm:$0x1]  ;;  %v1548_v27 = vld [vmem:[%s2269_s1 + $0x1c8] sm:$0xff]  ;;  %v1541_v29 = vld [vmem:[%s2269_s1 + $0x190] sm:$0xff] }
  0x25   : > { %436 = vmatpush1.msra.mxu0 %v1498_v38  ;;  %1662 = vmatpush3.msra.mxu1 %v1500_v37  ;;  %v1546_v30 = vld [vmem:[%s2269_s1 + $0x1b8] sm:$0xff]  ;;  %v1545_v31 = vld [vmem:[%s2269_s1 + $0x1b0] sm:$0xff]  ;;  %v1543_v32 = vld [vmem:[%s2269_s1 + $0x1a0] sm:$0xff] }
  0x26   : > { %437 = vmatprep.subr.mxu0 %v1496_v39  ;;  %1663 = vmatprep.subr.mxu1 %v1497_v40  ;;  %v1542_v33 = vld [vmem:[%s2269_s1 + $0x198] sm:$0xff]  ;;  %v1540_v34 = vld [vmem:[%s2269_s1 + $0x188] sm:$0xff]  ;;  %v1539_v35 = vld [vmem:[%s2269_s1 + $0x180] sm:$0xff] }
  0x27   : > { %301 = vmatprep.mubr.f32.mxu0 %v1769_v26  ;;  %438 = vmatpush1.msra.mxu0 %v1495_v41 }
  0x28   : > { %1664 = vmatpush3.msra.mxu1 %v1497_v40  ;;  %1483 = vmatmul.mubr.msk.f32.gmra.mxu0 %vm224_vm0, %v1897_v28 }
  0x29   : > { %439 = vmatprep.subr.mxu0 %v1493_v42  ;;  %1665 = vmatprep.subr.mxu1 %v1494_v43 }
  0x2a   : > { %440 = vmatpush1.msra.mxu0 %v1492_v44  ;;  %1666 = vmatpush3.msra.mxu1 %v1494_v43 }
  0x2b   : > { %441 = vmatprep.subr.mxu0 %v1490_v45  ;;  %1667 = vmatprep.subr.mxu1 %v1491_v46 }
  0x2c   : > { %442 = vmatpush1.msra.mxu0 %v1489_v47  ;;  %1668 = vmatpush3.msra.mxu1 %v1491_v46 }
  0x2d   : > { %443 = vmatprep.subr.mxu0 %v1487_v48  ;;  %1669 = vmatprep.subr.mxu1 %v1488_v49 }
  0x2e   : > { %444 = vmatpush1.msra.mxu0 %v1486_v50  ;;  %477 = vmatprep.mubr.f32.mxu0 %v1769_v26 }
  0x2f   : > { %1670 = vmatpush3.msra.mxu1 %v1488_v49  ;;  %1671 = vmatprep.mubr.msk.f32.mxu1 %vm224_vm0, %v1888_v24 }
  0x30   : > { %1510 = vmatmul.mubr.msk.f32.vlgmr.msra.gmra.mxu0 %vm224_vm0, %v1888_v24  ;;  %1672 = vmatmul.mubr.msk.f32.vlgmr.msra.gmra.mxu1 %vm224_vm0, %v1897_v28 }
  0x31   : > { %483 = vmatprep.mubr.f32.mxu0 %v1769_v26  ;;  %1674 = vmatprep.subr.mxu0 %v1769_v26 }
  0x32   : > { %651 = vmatprep.mubr.f32.mxu1 %v1769_v26 }
  0x34   : > { %1511 = vmatmul.mubr.msk.f32.gmra.mxu0 %vm224_vm0, %v1897_v28 }
  0x35   : > { %1678 = vmatprep.mubr.msk.f32.mxu0 %vm1770_vm1, %v1769_v26 }
  0xdc   : > { %v297_v51 = vpop.f32.mrf.mxu0 }
  0xde   : > { %v299_v52 = vpop.f32.mrf.mxu0  ;;  %v1654_v53 = vpop.f32.mrf.mxu1 }
  0xe0   : > { %v374_v55 = vpop.f32.mrf.mxu1 }
  0xe8   : > { %v303_v54 = vpop.f32.mrf.mxu0 }
  0xea   : > { %v305_v56 = vpop.f32.mrf.mxu0 }
  0xf0   : > { %v479_v57 = vpop.f32.mrf.mxu0  ;;  %v1673_v58 = vpop.f32.mrf.mxu1 }
  0xf1   : > { %1675 = vmatpush3.msra.mxu0 %v1673_v58 }
  0xf2   : > { %v481_v60 = vpop.f32.mrf.mxu0  ;;  %v556_v61 = vpop.f32.mrf.mxu1  ;;  %1676 = vmatprep.subr.mxu0 %v1769_v26 }
  0xf3   : > { %1677 = vmatpush3.msra.mxu0 %v556_v61 }
  0xf4   : > { %v485_v62 = vpop.f32.mrf.mxu0  ;;  %1679 = vmatmul.mubr.msk.f32.vlgmr.msra.gmra.mxu0 %vm571_vm2, %v1514_v59  ;;  %1693 = vmatprep.subr.mxu0 %v1769_v26 }
  0xf5   : > { %1694 = vmatpush3.msra.mxu0 %v1654_v53  ;;  %1681 = vmatprep.mubr.msk.f32.mxu0 %vm1770_vm1, %v1769_v26 }
  0xf6   : > { %v487_v0 = vpop.f32.mrf.mxu0  ;;  %1695 = vmatprep.subr.mxu0 %v1769_v26 }
  0xf7   : > { %615 = vmatprep.subr.mxu1 %v487_v0  ;;  %1696 = vmatpush3.msra.mxu0 %v374_v55 }
  0xf8   : > { %616 = vmatpush1.msra.mxu1 %v485_v62  ;;  %1682 = vmatmul.mubr.msk.f32.gmra.mxu0 %vm571_vm2, %v1515_v63 }
  0xf9   : > { %617 = vmatprep.subr.mxu1 %v481_v60  ;;  %1684 = vmatprep.mubr.msk.f32.mxu0 %vm1770_vm1, %v1769_v26 }
  0xfa   : > { %618 = vmatpush1.msra.mxu1 %v479_v57  ;;  %1712 = vmatprep.subr.mxu0 %v1562_v1 }
  0xfb   : > { %1519 = vmatmul.mubr.msk.f32.vlgmr.msra.gmra.mxu1 %vm571_vm2, %v1514_v59  ;;  %815 = vmatprep.subr.mxu1 %v305_v56 }
  0xfc   : > { %1685 = vmatmul.mubr.msk.f32.gmra.mxu0 %vm571_vm2, %v1516_v2  ;;  %816 = vmatpush1.msra.mxu1 %v303_v54 }
  0xfd   : > { %817 = vmatprep.subr.mxu1 %v299_v52  ;;  %657 = vmatprep.mubr.f32.mxu1 %v1769_v26 }
  0xfe   : > { %818 = vmatpush1.msra.mxu1 %v297_v51  ;;  %1687 = vmatprep.mubr.msk.f32.mxu0 %vm1770_vm1, %v1769_v26 }
  0xff   : > { %1520 = vmatmul.mubr.msk.f32.gmra.mxu1 %vm571_vm2, %v1515_v63  ;;  %1013 = vmatprep.subr.mxu1 %v1561_v3 }
 0x100   : > { %1688 = vmatmul.mubr.msk.f32.gmra.mxu0 %vm571_vm2, %v1517_v4  ;;  %663 = vmatprep.mubr.f32.mxu1 %v1769_v26 }
 0x101   : > { %1690 = vmatprep.mubr.msk.f32.mxu0 %vm1770_vm1, %v1769_v26 }
 0x103   : > { %1521 = vmatmul.mubr.msk.f32.gmra.mxu1 %vm571_vm2, %v1516_v2 }
 0x104   : > { %1691 = vmatmul.mubr.msk.f32.gmra.mxu0 %vm571_vm2, %v1518_v5  ;;  %669 = vmatprep.mubr.f32.mxu1 %v1769_v26 }
 0x105   : > { %1697 = vmatprep.mubr.msk.f32.mxu0 %vm1770_vm1, %v1769_v26 }
 0x107   : > { %1522 = vmatmul.mubr.msk.f32.gmra.mxu1 %vm571_vm2, %v1517_v4 }
 0x108   : > { %1698 = vmatmul.mubr.msk.f32.vlgmr.msra.gmra.mxu0 %vm571_vm2, %v383_v6  ;;  %675 = vmatprep.mubr.f32.mxu1 %v1769_v26 }
 0x109   : > { %1700 = vmatprep.mubr.msk.f32.mxu0 %vm1770_vm1, %v1769_v26  ;;  %1713 = vmatpush3.msra.mxu0 %v1562_v1 }
 0x10a   : > { %1714 = vmatprep.subr.mxu0 %v1559_v7 }
 0x10b   : > { %1523 = vmatmul.mubr.msk.f32.gmra.mxu1 %vm571_vm2, %v1518_v5  ;;  %1715 = vmatpush3.msra.mxu0 %v1559_v7 }
 0x10c   : > { %1701 = vmatmul.mubr.msk.f32.gmra.mxu0 %vm571_vm2, %v384_v8  ;;  %851 = vmatprep.mubr.f32.mxu1 %v1769_v26 }
 0x10d   : > { %1703 = vmatprep.mubr.msk.f32.mxu0 %vm1770_vm1, %v1769_v26  ;;  %1716 = vmatprep.subr.mxu0 %v1556_v9 }
 0x10e   : > { %1717 = vmatpush3.msra.mxu0 %v1556_v9 }
 0x10f   : > { %1529 = vmatmul.mubr.msk.f32.vlgmr.msra.gmra.mxu1 %vm571_vm2, %v383_v6  ;;  %1718 = vmatprep.subr.mxu0 %v1553_v10 }
 0x110   : > { %1704 = vmatmul.mubr.msk.f32.gmra.mxu0 %vm571_vm2, %v385_v11  ;;  %1014 = vmatpush1.msra.mxu1 %v1560_v12 }
 0x111   : > { %857 = vmatprep.mubr.f32.mxu1 %v1769_v26  ;;  %1015 = vmatprep.subr.mxu1 %v1558_v13 }
 0x112   : > { %1706 = vmatprep.mubr.msk.f32.mxu0 %vm1770_vm1, %v1769_v26  ;;  %1016 = vmatpush1.msra.mxu1 %v1557_v14 }
 0x113   : > { %1530 = vmatmul.mubr.msk.f32.gmra.mxu1 %vm571_vm2, %v384_v8  ;;  %1719 = vmatpush3.msra.mxu0 %v1553_v10 }
 0x114   : > { %1707 = vmatmul.mubr.msk.f32.gmra.mxu0 %vm571_vm2, %v386_v15  ;;  %1017 = vmatprep.subr.mxu1 %v1555_v16 }
 0x115   : > { %1720 = vmatprep.subr.mxu0 %v1550_v17  ;;  %1018 = vmatpush1.msra.mxu1 %v1554_v18 }
 0x116   : > { %1721 = vmatpush3.msra.mxu0 %v1550_v17  ;;  %863 = vmatprep.mubr.f32.mxu1 %v1769_v26 }
 0x117   : > { %1722 = vmatprep.subr.mxu0 %v1547_v19  ;;  %1531 = vmatmul.mubr.msk.f32.gmra.mxu1 %vm571_vm2, %v385_v11 }
 0x118   : > { %1709 = vmatprep.mubr.msk.f32.mxu0 %vm1770_vm1, %v1769_v26  ;;  %1019 = vmatprep.subr.mxu1 %v1552_v20 }
 0x119   : > { %1723 = vmatpush3.msra.mxu0 %v1547_v19  ;;  %1020 = vmatpush1.msra.mxu1 %v1551_v21 }
 0x11a   : > { %1710 = vmatmul.mubr.msk.f32.gmra.mxu0 %vm571_vm2, %v387_v22  ;;  %1724 = vmatprep.subr.mxu0 %v1544_v23 }
 0x11b   : > { %1021 = vmatprep.subr.mxu1 %v1549_v25  ;;  %1725 = vmatpush3.msra.mxu0 %v1544_v23 }
 0x11c   : > { %869 = vmatprep.mubr.f32.mxu1 %v1769_v26  ;;  %1022 = vmatpush1.msra.mxu1 %v1548_v27 }
 0x11d   : > { %1726 = vmatprep.subr.mxu0 %v1541_v29  ;;  %1532 = vmatmul.mubr.msk.f32.gmra.mxu1 %vm571_vm2, %v386_v15 }
 0x11e   : > { %1727 = vmatpush3.msra.mxu0 %v1541_v29  ;;  %1728 = vmatprep.mubr.msk.f32.mxu0 %vm224_vm0, %v1888_v24 }
 0x11f   : > { %1023 = vmatprep.subr.mxu1 %v1546_v30  ;;  %1729 = vmatmul.mubr.msk.f32.vlgmr.msra.gmra.mxu0 %vm224_vm0, %v1897_v28 }
 0x120   : > { %1024 = vmatpush1.msra.mxu1 %v1545_v31  ;;  %875 = vmatprep.mubr.f32.mxu1 %v1769_v26  ;;  %v1568_v31 = vld [vmem:[%s2270_s2 + $0x58] sm:$0xff] }
 0x121   : > { %1025 = vmatprep.subr.mxu1 %v1543_v32  ;;  %1533 = vmatmul.mubr.msk.f32.gmra.mxu1 %vm571_vm2, %v387_v22  ;;  %v1567_v22 = vld [vmem:[%s2270_s2 + $0x50] sm:$0xff] }
 0x122   : > { %1026 = vmatpush1.msra.mxu1 %v1542_v33  ;;  %1061 = vmatprep.mubr.f32.mxu1 %v1769_v26 }
 0x123   : > { %1027 = vmatprep.subr.mxu1 %v1540_v34  ;;  %1234 = vmatprep.mubr.f32.mxu0 %v1769_v26  ;;  %v1569_v34 = vld [vmem:[%s2270_s2 + $0x60] sm:$0xff] }
 0x124   : > { %1028 = vmatpush1.msra.mxu1 %v1539_v35 }
 0x125   : > { %1563 = vmatmul.mubr.msk.f32.vlgmr.msra.gmra.mxu1 %vm224_vm0, %v1888_v24  ;;  %1731 = vmatprep.subr.mxu1 %v1769_v26 }
 0x126   : > { %1067 = vmatprep.mubr.f32.mxu1 %v1769_v26 }
 0x129   : > { %1564 = vmatmul.mubr.msk.f32.gmra.mxu1 %vm224_vm0, %v1897_v28 }
 0x12a   : > { %1735 = vmatprep.mubr.msk.f32.mxu1 %vm1770_vm1, %v1769_v26 }
 0x1b4   : > { %v748_v36 = vpop.f32.mrf.mxu0 }
 0x1b6   : > { %v1680_v37 = vpop.f32.mrf.mxu0 }
 0x1b7   : > { %v1570_v37 = vld [vmem:[%s2270_s2 + $0x68] sm:$0xff] }
 0x1b8   : > { %v753_v38 = vpop.f32.mrf.mxu0 }
 0x1ba   : > { %v1683_v39 = vpop.f32.mrf.mxu0 }
 0x1bb   : > { %v653_v40 = vpop.f32.mrf.mxu1  ;;  %v1372_v39 = vlaneseq }
 0x1bc   : > { %v758_v41 = vpop.f32.mrf.mxu0 }
 0x1bd   : > { %v655_v42 = vpop.f32.mrf.mxu1 }
 0x1be   : > { %v1686_v43 = vpop.f32.mrf.mxu0 }
 0x1bf   : > { %v659_v44 = vpop.f32.mrf.mxu1 }
 0x1c0   : > { %v763_v24 = vpop.f32.mrf.mxu0 }
 0x1c1   : > { %v661_v45 = vpop.f32.mrf.mxu1 }
 0x1c2   : > { %v1689_v46 = vpop.f32.mrf.mxu0 }
 0x1c3   : > { %v665_v47 = vpop.f32.mrf.mxu1 }
 0x1c4   : > { %v768_v48 = vpop.f32.mrf.mxu0 }
 0x1c5   : > { %v667_v49 = vpop.f32.mrf.mxu1 }
 0x1c6   : > { %v1692_v50 = vpop.f32.mrf.mxu0 }
 0x1c7   : > { %v671_v28 = vpop.f32.mrf.mxu1 }
 0x1c8   : > { %v948_v51 = vpop.f32.mrf.mxu0 }
 0x1c9   : > { %v2154_v52 = vadd.f32 %v948_v51, %v748_v36  ;;  %v673_v53 = vpop.f32.mrf.mxu1 }
 0x1ca   : > { %v1699_v54 = vpop.f32.mrf.mxu0 }
 0x1cb   : > { %v677_v55 = vpop.f32.mrf.mxu1 }
 0x1cc   : > { %v953_v56 = vpop.f32.mrf.mxu0 }
 0x1cd   : > { %v2156_v57 = vadd.f32 %v953_v56, %v753_v38  ;;  %v679_v58 = vpop.f32.mrf.mxu1  ;;  %v1571_v38 = vld [vmem:[%s2270_s2 + $0x70] sm:$0x1] }
 0x1ce   : > { %v1702_v59 = vpop.f32.mrf.mxu0 }
 0x1cf   : > { %v853_v60 = vpop.f32.mrf.mxu1 }
 0x1d0   : > { %v2158_v61 = vadd.f32 %v853_v60, %v653_v40  ;;  %v958_v62 = vpop.f32.mrf.mxu0  ;;  %v1373_v40 = vshrl.u32 %v1372_v39, 7 }
 0x1d1   : > { %v2160_v63 = vadd.f32 %v958_v62, %v758_v41  ;;  %v855_v0 = vpop.f32.mrf.mxu1 }
 0x1d2   : > { %v2162_v1 = vadd.f32 %v855_v0, %v655_v42  ;;  %v1705_v2 = vpop.f32.mrf.mxu0  ;;  %v1382_v41 = vsub.s32 2, %v1373_v40  ;;  %v1370_v42 = vld [vmem:[%s2271_s3] sm:$0x7] }
 0x1d3   : > { %v859_v3 = vpop.f32.mrf.mxu1 }
 0x1d4   : > { %v2164_v4 = vadd.f32 %v859_v3, %v659_v44  ;;  %v963_v5 = vpop.f32.mrf.mxu0  ;;  %v1383_v43 = vrot.slane %v1370_v42, %v1382_v41 }
 0x1d5   : > { %v2166_v6 = vadd.f32 %v963_v5, %v763_v24  ;;  %v861_v7 = vpop.f32.mrf.mxu1 }
 0x1d6   : > { %v2168_v8 = vadd.f32 %v861_v7, %v661_v45  ;;  %v1708_v9 = vpop.f32.mrf.mxu0 }
 0x1d7   : > { %v865_v10 = vpop.f32.mrf.mxu1 }
 0x1d8   : > { %v2170_v11 = vadd.f32 %v865_v10, %v665_v47 }
 0x1d9   : > { %v867_v12 = vpop.f32.mrf.mxu1 }
 0x1da   : > { %v968_v13 = vpop.f32.mrf.mxu0  ;;  %v2172_v14 = vadd.f32 %v867_v12, %v667_v49 }
 0x1db   : > { %v2174_v15 = vadd.f32 %v968_v13, %v768_v48 }
 0x1dc   : > { %v1711_v16 = vpop.f32.mrf.mxu0 }
 0x1dd   : > { %v871_v17 = vpop.f32.mrf.mxu1 }
 0x1de   : > { %v2176_v18 = vadd.f32 %v871_v17, %v671_v28  ;;  %v1374_v28 = vsub.s32 0, %v1373_v40 }
 0x1df   : > { %v1730_v19 = vpop.f32.mrf.mxu0  ;;  %v873_v20 = vpop.f32.mrf.mxu1 }
 0x1e0   : > { %v2178_v21 = vadd.f32 %v873_v20, %v673_v53  ;;  %1732 = vmatpush3.msra.mxu1 %v1730_v19  ;;  %v1378_v53 = vsub.s32 1, %v1373_v40  ;;  %v1375_v56 = vrot.slane %v1370_v42, %v1374_v28 }
 0x1e1   : > { %v1140_v23 = vpop.f32.mrf.mxu0  ;;  %1733 = vmatprep.subr.mxu1 %v1769_v26  ;;  %v877_v25 = vpop.f32.mrf.mxu1 }
 0x1e2   : > { %v2184_v27 = vadd.f32 %v877_v25, %v677_v55  ;;  %1734 = vmatpush3.msra.mxu1 %v1140_v23  ;;  %v1379_v62 = vrot.slane %v1370_v42, %v1378_v53 }
 0x1e3   : > { %1736 = vmatmul.mubr.msk.f32.vlgmr.msra.gmra.mxu1 %vm571_vm2, %v1567_v22  ;;  %v879_v29 = vpop.f32.mrf.mxu1 }
 0x1e4   : > { %v2187_v30 = vadd.f32 %v879_v29, %v679_v58  ;;  %1738 = vmatprep.mubr.msk.f32.mxu1 %vm1770_vm1, %v1769_v26 }
 0x1e5   : > { %v1063_v32 = vpop.f32.mrf.mxu1 }
 0x1e7   : > { %1739 = vmatmul.mubr.msk.f32.gmra.mxu1 %vm571_vm2, %v1568_v31  ;;  %v1065_v33 = vpop.f32.mrf.mxu1 }
 0x1e8   : > { %1741 = vmatprep.mubr.msk.f32.mxu1 %vm1770_vm1, %v1769_v26 }
 0x1e9   : > { %v1069_v35 = vpop.f32.mrf.mxu1 }
 0x1eb   : > { %1742 = vmatmul.mubr.msk.f32.gmra.mxu1 %vm571_vm2, %v1569_v34  ;;  %v1071_v36 = vpop.f32.mrf.mxu1 }
 0x1ec   : > { %1198 = vmatprep.subr.mxu0 %v1071_v36  ;;  %1744 = vmatprep.mubr.msk.f32.mxu1 %vm1770_vm1, %v1769_v26 }
 0x1ed   : > { %1199 = vmatpush1.msra.mxu0 %v1069_v35 }
 0x1ee   : > { %1200 = vmatprep.subr.mxu0 %v1065_v33 }
 0x1ef   : > { %1745 = vmatmul.mubr.msk.f32.gmra.mxu1 %vm571_vm2, %v1570_v37  ;;  %1201 = vmatpush1.msra.mxu0 %v1063_v32 }
 0x1f0   : > { %1572 = vmatmul.mubr.msk.f32.vlgmr.msra.gmra.mxu0 %vm571_vm2, %v1567_v22  ;;  %1747 = vmatprep.mubr.msk.f32.mxu1 %vm1770_vm1, %v1769_v26 }
 0x1f1   : > { %1240 = vmatprep.mubr.f32.mxu0 %v1769_v26 }
 0x1f3   : > { %1748 = vmatmul.mubr.msk.f32.gmra.mxu1 %vm571_vm2, %v1571_v38 }
 0x1f4   : > { %1573 = vmatmul.mubr.msk.f32.gmra.mxu0 %vm571_vm2, %v1568_v31 }
 0x1f5   : > { %1246 = vmatprep.mubr.f32.mxu0 %v1769_v26 }
 0x1f8   : > { %1574 = vmatmul.mubr.msk.f32.gmra.mxu0 %vm571_vm2, %v1569_v34 }
 0x1f9   : > { %1252 = vmatprep.mubr.f32.mxu0 %v1769_v26 }
 0x1fc   : > { %1575 = vmatmul.mubr.msk.f32.gmra.mxu0 %vm571_vm2, %v1570_v37 }
 0x1fd   : > { %1258 = vmatprep.mubr.f32.mxu0 %v1769_v26 }
 0x200   : > { %1576 = vmatmul.mubr.msk.f32.gmra.mxu0 %vm571_vm2, %v1571_v38 }
 0x2a3   : > { %v1331_v44 = vpop.f32.mrf.mxu1 }
 0x2a4   : > { %v1357_v24 = vadd.f32 %v1331_v44, %v2154_v52 }
 0x2a5   : > { %v1737_v26 = vpop.f32.mrf.mxu1 }
 0x2a6   : > { %v1389_v45 = vadd.f32 %v1383_v43, %v1357_v24 }
 0x2a7   : > { %v1336_v46 = vpop.f32.mrf.mxu1 }
 0x2a8   : > { %1405 = vst.msk [vmem:[%s2230_s7 + $0x10] sm:$0xff] %vm1404_vm3, %v1389_v45  ;;  %v1360_v47 = vadd.f32 %v1336_v46, %v2156_v57 }
 0x2a9   : > { %v1740_v48 = vpop.f32.mrf.mxu1 }
 0x2aa   : > { %v1392_v49 = vadd.f32 %v1383_v43, %v1360_v47 }
 0x2ab   : > { %v1341_v50 = vpop.f32.mrf.mxu1 }
 0x2ac   : > { %1408 = vst.msk [vmem:[%s2230_s7 + $0x28] sm:$0xff] %vm1404_vm3, %v1392_v49  ;;  %v1363_v51 = vadd.f32 %v1341_v50, %v2160_v63 }
 0x2ad   : > { %v1743_v52 = vpop.f32.mrf.mxu1 }
 0x2ae   : > { %v1395_v54 = vadd.f32 %v1383_v43, %v1363_v51 }
 0x2af   : > { %v1346_v55 = vpop.f32.mrf.mxu1 }
 0x2b0   : > { %1411 = vst.msk [vmem:[%s2230_s7 + $0x40] sm:$0xff] %vm1404_vm3, %v1395_v54  ;;  %v1366_v58 = vadd.f32 %v1346_v55, %v2166_v6  ;;  %v1236_v57 = vpop.f32.mrf.mxu0 }
 0x2b1   : > { %v1355_v59 = vadd.f32 %v1236_v57, %v2158_v61  ;;  %v1746_v60 = vpop.f32.mrf.mxu1 }
 0x2b2   : > { %v1398_v0 = vadd.f32 %v1383_v43, %v1366_v58  ;;  %v1238_v2 = vpop.f32.mrf.mxu0 }
 0x2b3   : > { %v1387_v63 = vadd.f32 %v1375_v56, %v1355_v59  ;;  %v1356_v3 = vadd.f32 %v1238_v2, %v2162_v1  ;;  %v1351_v5 = vpop.f32.mrf.mxu1 }
 0x2b4   : > { %1414 = vst.msk [vmem:[%s2230_s7 + $0x58] sm:$0xff] %vm1404_vm3, %v1398_v0  ;;  %v1369_v7 = vadd.f32 %v1351_v5, %v2174_v15  ;;  %v1242_v9 = vpop.f32.mrf.mxu0 }
 0x2b5   : > { %1402 = vst [vmem:[%s2230_s7] sm:$0xff] %v1387_v63  ;;  %v1388_v6 = vadd.f32 %v1379_v62, %v1356_v3  ;;  %v1358_v61 = vadd.f32 %v1242_v9, %v2164_v4  ;;  %v1749_v10 = vpop.f32.mrf.mxu1 }
 0x2b6   : > { %v1401_v12 = vadd.f32 %v1383_v43, %v1369_v7  ;;  %v1244_v13 = vpop.f32.mrf.mxu0 }
 0x2b7   : > { %1403 = vst [vmem:[%s2230_s7 + $0x8] sm:$0xff] %v1388_v6  ;;  %v1390_v16 = vadd.f32 %v1375_v56, %v1358_v61  ;;  %v1359_v1 = vadd.f32 %v1244_v13, %v2168_v8 }
 0x2b8   : > { %1418 = vst.msk [vmem:[%s2230_s7 + $0x70] sm:$0x1] %vm1417_vm4, %v1401_v12  ;;  %v1248_v17 = vpop.f32.mrf.mxu0 }
 0x2b9   : > { %1406 = vst [vmem:[%s2230_s7 + $0x18] sm:$0xff] %v1390_v16  ;;  %v1391_v15 = vadd.f32 %v1379_v62, %v1359_v1  ;;  %v1361_v19 = vadd.f32 %v1248_v17, %v2170_v11 }
 0x2ba   : > { %v1250_v20 = vpop.f32.mrf.mxu0 }
 0x2bb   : > { %1407 = vst [vmem:[%s2230_s7 + $0x20] sm:$0xff] %v1391_v15  ;;  %v1393_v4 = vadd.f32 %v1375_v56, %v1361_v19  ;;  %v1362_v22 = vadd.f32 %v1250_v20, %v2172_v14 }
 0x2bc   : > { %v1254_v23 = vpop.f32.mrf.mxu0 }
 0x2bd   : > { %1409 = vst [vmem:[%s2230_s7 + $0x30] sm:$0xff] %v1393_v4  ;;  %v1394_v25 = vadd.f32 %v1379_v62, %v1362_v22  ;;  %v1364_v8 = vadd.f32 %v1254_v23, %v2176_v18 }
 0x2be   : > { %v1256_v29 = vpop.f32.mrf.mxu0 }
 0x2bf   : > { %1410 = vst [vmem:[%s2230_s7 + $0x38] sm:$0xff] %v1394_v25  ;;  %v1396_v31 = vadd.f32 %v1375_v56, %v1364_v8  ;;  %v1365_v32 = vadd.f32 %v1256_v29, %v2178_v21 }
 0x2c0   : > { %v1260_v33 = vpop.f32.mrf.mxu0 }
 0x2c1   : > { %1412 = vst [vmem:[%s2230_s7 + $0x48] sm:$0xff] %v1396_v31  ;;  %v1397_v11 = vadd.f32 %v1379_v62, %v1365_v32  ;;  %v1367_v34 = vadd.f32 %v1260_v33, %v2184_v27 }
 0x2c2   : > { %v1262_v35 = vpop.f32.mrf.mxu0 }
 0x2c3   : > { %1413 = vst [vmem:[%s2230_s7 + $0x50] sm:$0xff] %v1397_v11  ;;  %v1399_v14 = vadd.f32 %v1375_v56, %v1367_v34  ;;  %v1368_v36 = vadd.f32 %v1262_v35, %v2187_v30 }
 0x2c5   : > { %1415 = vst [vmem:[%s2230_s7 + $0x60] sm:$0x1] %v1399_v14  ;;  %v1400_v37 = vadd.f32 %v1379_v62, %v1368_v36 }
 0x2c7   : > { %1416 = vst [vmem:[%s2230_s7 + $0x68] sm:$0x1] %v1400_v37 }
 0x2c8 PF: > { %s14_s15 = sadd.s32 1, %s1767_s15  }
 0x2c9   : > { %p11_p4 = scmp.ge.s32.totalorder %s14_s15, 4  }
 0x2cb   :  { %13 = sbr.rel (!%p11_p4) target bundleno = 1 (0x1), region = 70 }

</bundles_post_ra>
